<compile_context>
chip_gen: v7x
topology: tpu7x:2x2x1
jax: 0.10.0
libtpu: 0.0.40
codegen_flags: <defaults>
</compile_context>

<pallas_src>
import numpy as np
import jax
import jax.numpy as jnp
from jax.experimental import pallas as pl
from jax.experimental.pallas import tpu as pltpu

SPATIAL_IN, SPATIAL_OUT = 2, 5
T_IN, T_OUT = 10, 30
LANE = 128                      # TPU vreg lane width
D_IN = 2 * T_IN                 # 20 valid stage-1 input columns
K1 = 32                         # stage-1 input width (20 data + 1 bias + pad), bf16-friendly
BIAS_COL = D_IN                 # constant-1 column of the augmented input
D_H = T_IN * SPATIAL_OUT        # 50 valid stage-1 output columns (per 128-lane half)
D_OUT = T_OUT * SPATIAL_OUT     # 150 valid stage-2 output columns
ROW_TILE = 256                  # rows per grid step in the batched (gridded) path
SINGLE_BLOCK_ROWS = 512         # <= this: single no-grid VMEM-resident call
PREC = jax.lax.Precision.HIGHEST


# ----------------------------------------------------------------------------
# Host-side, ONE-TIME lowering: 'same'-padded Conv1d (odd kernel) -> matrix.
# ----------------------------------------------------------------------------
def conv1d_as_matmul(W, b, L, in_layout, out_layout):
    """W: [Co, Ci, K], b: [Co].  Flat index of (channel c, position p):
         'lc' -> p*C + c (position-major)   'cl' -> c*L + p (channel-major)
       Returns M [L*Ci, L*Co], b_flat [L*Co] with out_flat = in_flat @ M + b_flat."""
    Co, Ci, K = W.shape
    P = (K - 1) // 2
    M = np.zeros((L * Ci, L * Co), np.float32)
    bf = np.zeros((L * Co,), np.float32)

    def idx(layout, c, pos, C):
        return c * L + pos if layout == "cl" else pos * C + c

    for co in range(Co):
        for t in range(L):
            bf[idx(out_layout, co, t, Co)] = b[co]
            for ci in range(Ci):
                for k in range(K):
                    s = t + k - P
                    if 0 <= s < L:
                        M[idx(in_layout, ci, s, Ci), idx(out_layout, co, t, Co)] = W[co, ci, k]
    return M, bf


def lower_social_cell_params(params):
    """Run once per weight set; returns cached device arrays (bf16 fused matrices)."""
    ncnn_w = np.asarray(params["ncnn_w"], np.float32)
    # Conv2d with H=1, padding=1: only the middle kernel row (kh=1) touches real data.
    Mcond, bcond = conv1d_as_matmul(ncnn_w[:, :, 1, :], np.asarray(params["ncnn_b"], np.float32),
                                    L=2, in_layout="cl", out_layout="cl")          # [40, 20]
    M1f, b1f = conv1d_as_matmul(np.asarray(params["feat_w"], np.float32),
                                np.asarray(params["feat_b"], np.float32),
                                L=T_IN, in_layout="lc", out_layout="lc")           # [20, 50]
    M1h, b1h = conv1d_as_matmul(np.asarray(params["hwin_w"], np.float32),
                                np.asarray(params["hwin_b"], np.float32),
                                L=T_IN, in_layout="lc", out_layout="lc")           # [20, 50]
    M2tp, b2tp = conv1d_as_matmul(np.asarray(params["tp_w"], np.float32),
                                  np.asarray(params["tp_b"], np.float32),
                                  L=SPATIAL_OUT, in_layout="cl", out_layout="cl")  # [50, 150]
    M2hw, b2hw = conv1d_as_matmul(np.asarray(params["hw_w"], np.float32),
                                  np.asarray(params["hw_b"], np.float32),
                                  L=SPATIAL_OUT, in_layout="cl", out_layout="cl")

    # Fused stage-1 matrix [32, 256]: cols 0..127 = feat, 128..255 = highway_input.
    # Row BIAS_COL is the bias row (activated by the constant-1 input column); its
    # last entry plants the 1.0 at h1[:,127] that carries the stage-2 bias.
    M1 = np.zeros((K1, 2 * LANE), np.float32)
    M1[:D_IN, :D_H] = M1f
    M1[:D_IN, LANE:LANE + D_H] = M1h
    M1[BIAS_COL, :D_H] = b1f
    M1[BIAS_COL, LANE:LANE + D_H] = b1h
    M1[BIAS_COL, 2 * LANE - 1] = 1.0          # -> h1[:,127] == 1.0 for valid rows

    # Fused stage-2 matrix [128, 256] (tpcnn + highway); row 127 carries their biases.
    M2 = np.zeros((LANE, 2 * LANE), np.float32)
    M2[:D_H, :D_OUT] = M2tp + M2hw
    M2[LANE - 1, :D_OUT] = b2tp + b2hw

    return {
        "Mcond": jnp.asarray(Mcond, jnp.float32),
        "bcond": jnp.asarray(bcond, jnp.float32).reshape(1, -1),
        "w": jnp.asarray(params["w"], jnp.float32).reshape(()),
        "M1": jnp.asarray(M1, jnp.bfloat16),
        "M2": jnp.asarray(M2, jnp.bfloat16),
    }


# ----------------------------------------------------------------------------
# Pallas kernel: two fused bf16 MXU matmuls (biases folded into the matrices).
# ----------------------------------------------------------------------------
def social_cell_kernel(x_ref, m1_ref, m2_ref, out_ref):
    # stage 1: feat (cols 0..127) + highway_input (cols 128..255) in one MXU push
    y = jnp.dot(x_ref[...], m1_ref[...], preferred_element_type=jnp.float32)
    h1 = jnp.maximum(y[:, :LANE], 0.0) + y[:, LANE:]          # [rows, 128]; h1[:,127] == 1
    # stage 2: tpcnn + highway fused; lane-dense (256-wide) output store
    out_ref[...] = jnp.dot(h1.astype(m2_ref.dtype), m2_ref[...],
                           preferred_element_type=jnp.float32)


def _round_up(n, m):
    return ((n + m - 1) // m) * m


def _run_rows(rows, lowered):
    """rows: [R0, 20] f32 (v = x + w*cond per pedestrian).  Returns [R0, 150] f32."""
    R0 = rows.shape[0]
    single = R0 <= SINGLE_BLOCK_ROWS
    R = _round_up(R0, 16) if single else _round_up(R0, ROW_TILE)

    # augmented bf16 input: [R, 32] = [v | 1 | 0-pad]; padded rows stay all-zero
    x_aug = jnp.zeros((R, K1), jnp.float32)
    x_aug = x_aug.at[:R0, :D_IN].set(rows)
    x_aug = x_aug.at[:R0, BIAS_COL].set(1.0)
    x_aug = x_aug.astype(jnp.bfloat16)

    if single:
        # no grid, no pipeline machinery: everything resident in VMEM for one invocation
        out = pl.pallas_call(
            social_cell_kernel,
            out_shape=jax.ShapeDtypeStruct((R, 2 * LANE), jnp.float32),
            in_specs=[pl.BlockSpec(memory_space=pltpu.MemorySpace.VMEM)] * 3,
            out_specs=pl.BlockSpec(memory_space=pltpu.MemorySpace.VMEM),
        )(x_aug, lowered["M1"], lowered["M2"])
    else:
        # batched path: row grid; "parallel" lets v7x's two TensorCores split the rows
        out = pl.pallas_call(
            social_cell_kernel,
            out_shape=jax.ShapeDtypeStruct((R, 2 * LANE), jnp.float32),
            grid=(R // ROW_TILE,),
            in_specs=[
                pl.BlockSpec((ROW_TILE, K1), lambda i: (i, 0)),        # row tile of v
                pl.BlockSpec((K1, 2 * LANE), lambda i: (0, 0)),        # stage-1 weights (resident)
                pl.BlockSpec((LANE, 2 * LANE), lambda i: (0, 0)),      # stage-2 weights (resident)
            ],
            out_specs=pl.BlockSpec((ROW_TILE, 2 * LANE), lambda i: (i, 0)),
            compiler_params=pltpu.CompilerParams(dimension_semantics=("parallel",)),
        )(x_aug, lowered["M1"], lowered["M2"])
    return out[:R0, :D_OUT]


def _condition_term(x_lead_flat, lowered):
    """x_lead_flat: [..., 40] (10 lead positions + 10 noise rows).  Returns w*relu(cond)."""
    cond = jnp.maximum(jnp.dot(x_lead_flat, lowered["Mcond"], precision=PREC)
                       + lowered["bcond"], 0.0)
    return lowered["w"] * cond                                  # [..., 20]


# ----------------------------------------------------------------------------
# Public wrappers
# ----------------------------------------------------------------------------
def social_cell_local_forward(x, lowered, noise_vec):
    """Single scene: x [1, 10, N, F], noise_vec [2] -> [1, 30, N, 5]."""
    _, T, N, _ = x.shape
    assert T == T_IN
    x_lead = x[0, :, 1, :2]                                               # [10, 2]
    noise_rows = jnp.broadcast_to(noise_vec.reshape(1, 2), (T_IN, 2))
    cond_flat = jnp.concatenate([x_lead, noise_rows], axis=0).reshape(1, 4 * T_IN)
    wcond = _condition_term(cond_flat, lowered)                           # [1, 20]

    X = jnp.transpose(x[0, :, :, :2], (1, 0, 2)).reshape(N, D_IN)         # [N, 20]
    rows = X + wcond                                                      # v = x + w*cond
    out = _run_rows(rows, lowered).reshape(N, T_OUT, SPATIAL_OUT)
    return jnp.transpose(out, (1, 0, 2))[None]                            # [1, 30, N, 5]


def social_cell_local_forward_batched(xs, lowered, noise_vecs):
    """Throughput path: xs [B, 1, 10, N, F], noise_vecs [B, 2] -> [B, 1, 30, N, 5].
    All B*N pedestrian rows go through ONE pallas_call (row grid, 'parallel')."""
    B, _, T, N, _ = xs.shape
    assert T == T_IN
    x_leads = xs[:, 0, :, 1, :2]                                          # [B, 10, 2]
    noise_rows = jnp.broadcast_to(noise_vecs[:, None, :], (B, T_IN, 2))
    cond_flat = jnp.concatenate([x_leads, noise_rows], axis=1).reshape(B, 4 * T_IN)
    wcond = _condition_term(cond_flat, lowered)                           # [B, 20]

    X = jnp.transpose(xs[:, 0, :, :, :2], (0, 2, 1, 3)).reshape(B, N, D_IN)
    rows = (X + wcond[:, None, :]).reshape(B * N, D_IN)
    out = _run_rows(rows, lowered).reshape(B, N, T_OUT, SPATIAL_OUT)
    return jnp.transpose(out, (0, 2, 1, 3))[:, None]                      # [B, 1, 30, N, 5]


# ----------------------------------------------------------------------------
# Pure-JAX reference (mirrors the PyTorch forward) for correctness checking.
# ----------------------------------------------------------------------------
def _conv1d_nch(x, w, b, pad):
    y = jax.lax.conv_general_dilated(x, w, window_strides=(1,), padding=((pad, pad),),
                                     dimension_numbers=("NCH", "OIH", "NCH"),
                                     precision=PREC)
    return y + b.reshape(1, -1, 1)


def reference_forward(x, p, noise_vec):
    x_lead = x[:, :, 1:2, :2]
    noise = jnp.broadcast_to(noise_vec.reshape(1, 1, 1, 2), (1, x_lead.shape[1], 1, 2))
    condition = jnp.concatenate([x_lead, noise], axis=1)
    c = jax.lax.conv_general_dilated(condition, p["ncnn_w"], (1, 1), ((1, 1), (1, 1)),
                                     dimension_numbers=("NCHW", "OIHW", "NCHW"),
                                     precision=PREC)
    condition = jnp.maximum(c + p["ncnn_b"].reshape(1, -1, 1, 1), 0.0)
    v = x[..., :2] + p["w"][0] * condition
    v = jnp.transpose(v, (0, 2, 3, 1))[0]                       # [N, 2, 10]
    v_res = _conv1d_nch(v, p["hwin_w"], p["hwin_b"], 0)
    v = jnp.maximum(_conv1d_nch(v, p["feat_w"], p["feat_b"], 1), 0.0) + v_res
    v = jnp.transpose(v, (0, 2, 1))                             # [N, 10, 5]
    v_res = _conv1d_nch(v, p["hw_w"], p["hw_b"], 0)
    v = _conv1d_nch(v, p["tp_w"], p["tp_b"], 1) + v_res         # [N, 30, 5]
    return jnp.transpose(v, (1, 0, 2))[None]                    # [1, 30, N, 5]


if __name__ == "__main__":
    key = jax.random.PRNGKey(0)
    ks = jax.random.split(key, 15)
    params = {
        "feat_w": 0.2 * jax.random.normal(ks[0], (SPATIAL_OUT, SPATIAL_IN, 3), jnp.float32),
        "feat_b": 0.1 * jax.random.normal(ks[1], (SPATIAL_OUT,), jnp.float32),
        "hwin_w": 0.2 * jax.random.normal(ks[2], (SPATIAL_OUT, SPATIAL_IN, 1), jnp.float32),
        "hwin_b": 0.1 * jax.random.normal(ks[3], (SPATIAL_OUT,), jnp.float32),
        "hw_w":   0.2 * jax.random.normal(ks[4], (T_OUT, T_IN, 1), jnp.float32),
        "hw_b":   0.1 * jax.random.normal(ks[5], (T_OUT,), jnp.float32),
        "tp_w":   0.2 * jax.random.normal(ks[6], (T_OUT, T_IN, 3), jnp.float32),
        "tp_b":   0.1 * jax.random.normal(ks[7], (T_OUT,), jnp.float32),
        "w":      jax.random.normal(ks[8], (1,), jnp.float32),
        "ncnn_w": 0.1 * jax.random.normal(ks[9], (T_IN, 2 * T_IN, 3, 3), jnp.float32),
        "ncnn_b": 0.1 * jax.random.normal(ks[10], (T_IN,), jnp.float32),
    }
    # one-time lowering + upload; everything below reuses these cached device arrays
    lowered = lower_social_cell_params(params)

    N, F = 12, 3
    x = jax.random.normal(ks[11], (1, T_IN, N, F), jnp.float32)
    # MultivariateNormal(zeros(2), I_2) sample == standard normal pair.
    # TODO(synk): torch.distributions sampling has no in-kernel equivalent; drawn host-side.
    noise_vec = jax.random.normal(ks[12], (2,), jnp.float32)

    # --- single scene (no-grid, VMEM-resident path)
    out = jax.block_until_ready(social_cell_local_forward(x, lowered, noise_vec))
    assert out.shape == (1, T_OUT, N, SPATIAL_OUT), out.shape
    ref = reference_forward(x, params, noise_vec)
    assert jnp.allclose(out, ref, rtol=2e-2, atol=2e-2), float(jnp.max(jnp.abs(out - ref)))

    # --- batched scenes (row-grid "parallel" path; one pallas_call for all B*N rows)
    B = 48
    xs = jax.random.normal(ks[13], (B, 1, T_IN, N, F), jnp.float32)
    noise_vecs = jax.random.normal(ks[14], (B, 2), jnp.float32)
    outs = jax.block_until_ready(social_cell_local_forward_batched(xs, lowered, noise_vecs))
    assert outs.shape == (B, 1, T_OUT, N, SPATIAL_OUT), outs.shape
    for b in (0, B // 2, B - 1):
        refb = reference_forward(xs[b], params, noise_vecs[b])
        assert jnp.allclose(outs[b], refb, rtol=2e-2, atol=2e-2), \
            (b, float(jnp.max(jnp.abs(outs[b] - refb))))

    print("KERNEL_OK")
</pallas_src>

<mosaic_0001>
module attributes {stable_mosaic.version = 11 : i64} {
  func.func @social_cell_kernel(%arg0: memref<16x32xbf16, #tpu.memory_space<vmem>>, %arg1: memref<32x256xbf16, #tpu.memory_space<vmem>>, %arg2: memref<128x256xbf16, #tpu.memory_space<vmem>>, %arg3: memref<16x256xf32, #tpu.memory_space<vmem>>) attributes {dimension_semantics = [], scalar_prefetch = 0 : i64, scratch_operands = 0 : i64, tpu.core_type = #tpu.core_type<tc>} {
    %c0 = arith.constant 0 : index
    %c0_0 = arith.constant 0 : index
    %0 = vector.load %arg0[%c0, %c0_0] : memref<16x32xbf16, #tpu.memory_space<vmem>>, vector<16x32xbf16>
    %c0_1 = arith.constant 0 : index
    %c0_2 = arith.constant 0 : index
    %1 = vector.load %arg1[%c0_1, %c0_2] : memref<32x256xbf16, #tpu.memory_space<vmem>>, vector<32x256xbf16>
    %cst = arith.constant dense<0.000000e+00> : vector<16x256xf32>
    %2 = tpu.matmul %0, %1, %cst {dimension_numbers = #tpu.dot_dimension_numbers<[1], [0], [0], [1], [0, 0, 1, 1], [], []>} : vector<16x32xbf16>, vector<32x256xbf16>, vector<16x256xf32> -> vector<16x256xf32>
    %3 = vector.extract_strided_slice %2 {offsets = [0, 0], sizes = [16, 128], strides = [1, 1]} : vector<16x256xf32> to vector<16x128xf32>
    %cst_3 = arith.constant 0.000000e+00 : f32
    %4 = vector.broadcast %cst_3 : f32 to vector<16x128xf32>
    %5 = arith.maximumf %3, %4 : vector<16x128xf32>
    %6 = vector.extract_strided_slice %2 {offsets = [0, 128], sizes = [16, 128], strides = [1, 1]} : vector<16x256xf32> to vector<16x128xf32>
    %7 = arith.addf %5, %6 : vector<16x128xf32>
    %8 = arith.truncf %7 : vector<16x128xf32> to vector<16x128xbf16>
    %c0_4 = arith.constant 0 : index
    %c0_5 = arith.constant 0 : index
    %9 = vector.load %arg2[%c0_4, %c0_5] : memref<128x256xbf16, #tpu.memory_space<vmem>>, vector<128x256xbf16>
    %cst_6 = arith.constant dense<0.000000e+00> : vector<16x256xf32>
    %10 = tpu.matmul %8, %9, %cst_6 {dimension_numbers = #tpu.dot_dimension_numbers<[1], [0], [0], [1], [0, 0, 1, 1], [], []>} : vector<16x128xbf16>, vector<128x256xbf16>, vector<16x256xf32> -> vector<16x256xf32>
    %c0_7 = arith.constant 0 : index
    %c0_8 = arith.constant 0 : index
    %11 = vector.load %arg3[%c0_7, %c0_8] : memref<16x256xf32, #tpu.memory_space<vmem>>, vector<16x256xf32>
    tpu.vector_store %arg3[%c0_7, %c0_8], %10 {strides = array<i32>} : memref<16x256xf32, #tpu.memory_space<vmem>>, vector<16x256xf32>,
    return
  }
}

</mosaic_0001>

<bundles_post_ra>
// kernel: tpu_custom_call.1
= control target key start
LH: loop header
LB: loop body
LE: loop exit
PB: predicated region body
PF: predicated region fallthrough
CT: control target
= control target key end

     0   :  { %8 = vsyncpa [#allocation3], 0  ;;  %s544_s0 = inlined_call_operand.hbm [shape: bf16[16,32], index: 0, kind: input, shape index: {}]   ;;  %s545_s1 = inlined_call_operand.hbm [shape: bf16[32,256], index: 1, kind: input, shape index: {}]   ;;  %s546_s2 = inlined_call_operand.hbm [shape: bf16[128,256], index: 2, kind: input, shape index: {}]   ;;  %s547_s3 = inlined_call_operand.hbm [shape: f32[16,256], index: 3, kind: output, shape index: {}]  }
   0x1   :  { %9 = vsyncpa [#allocation6], 0 }
   0x2   :  { %10 = vsyncpa [#allocation4], 0  ;;  %s459_s12 = smov [#allocation5]   ;;  %s365_s16 = scalar_lea.hbm %s545_s1, 512 }
   0x3   :  { %s28_s13 = sshll.u32 %s459_s12, 4  ;;  %p366_p0 = scmp.ne.s32.totalorder %s545_s1, %s365_s16  ;;  %s29_s13 = int_to_ptr.vmem [resolvable:$true] %s28_s13 }
   0x4   :  { %p369_p1 = scmp.lt.u32.totalorder %s365_s16, %s545_s1 }
   0x6   :  { %p371_p2 = pnand %p369_p1, %p366_p0 }
   0x8   :  { %374 = shalt.err (!%p371_p2)
}
   0x9   :  { %s375_s21 = scalar_lea.vmem %s29_s13, 512  ;;  %p380_p4 = scmp.lt.s32.totalorder %s29_s13, %s29_s13 }
   0xa   :  { %p376_p3 = scmp.ne.s32.totalorder %s29_s13, %s375_s21  ;;  %p381_p5 = scmp.lt.s32.totalorder %s375_s21, %s375_s21 }
   0xc   :  { %p382_p6 = por %p381_p5, %p380_p4 }
   0xe   :  { %p383_p7 = pnand %p382_p6, %p376_p3 }
  0x10   :  { %386 = shalt.err (!%p383_p7)
}
  0x11   :  { %s460_s22 = smov 128   ;;  %s461_s23 = smov 8  }
  0x12   :  { %34 = dma.hbm_to_vmem [thread:$0]  %s545_s1, 512, %s29_s13, [#allocation6], %s460_s22, %s460_s22, %s461_s23  }
  0x13   :  { %s462_s26 = smov [#allocation2]   ;;  %s387_s30 = scalar_lea.hbm %s544_s0, 128 }
  0x14   :  { %s16_s27 = sshll.u32 %s462_s26, 4  ;;  %p388_p8 = scmp.ne.s32.totalorder %s544_s0, %s387_s30  ;;  %s17_s27 = int_to_ptr.vmem [resolvable:$true] %s16_s27 }
  0x15   :  { %p391_p9 = scmp.lt.u32.totalorder %s387_s30, %s544_s0 }
  0x17   :  { %p393_p10 = pnand %p391_p9, %p388_p8 }
  0x19   :  { %396 = shalt.err (!%p393_p10)
}
  0x1a   :  { %s397_s8 = scalar_lea.vmem %s17_s27, 128  ;;  %p402_p12 = scmp.lt.s32.totalorder %s17_s27, %s17_s27 }
  0x1b   :  { %p398_p11 = scmp.ne.s32.totalorder %s17_s27, %s397_s8  ;;  %p403_p13 = scmp.lt.s32.totalorder %s397_s8, %s397_s8 }
  0x1d   :  { %p404_p0 = por %p403_p13, %p402_p12 }
  0x1f   :  { %p405_p1 = pnand %p404_p0, %p398_p11 }
  0x21   :  { %408 = shalt.err (!%p405_p1)
}
  0x22   :  { %s463_s1 = smov 64   ;;  %s464_s9 = smov 4  }
  0x23   :  { %22 = dma.hbm_to_vmem [thread:$0]  %s544_s0, 128, %s17_s27, [#allocation3], %s463_s1, %s463_s1, %s464_s9  }
  0x24   :  { %s465_s12 = smov [#allocation7]   ;;  %s409_s16 = scalar_lea.hbm %s546_s2, 2048 }
  0x25   :  { %s40_s13 = sshll.u32 %s465_s12, 4  ;;  %p410_p2 = scmp.ne.s32.totalorder %s546_s2, %s409_s16  ;;  %s41_s13 = int_to_ptr.vmem [resolvable:$true] %s40_s13 }
  0x26   :  { %p413_p3 = scmp.lt.u32.totalorder %s409_s16, %s546_s2 }
  0x28   :  { %p415_p4 = pnand %p413_p3, %p410_p2 }
  0x2a   :  { %418 = shalt.err (!%p415_p4)
}
  0x2b   :  { %s419_s21 = scalar_lea.vmem %s41_s13, 2048  ;;  %p424_p6 = scmp.lt.s32.totalorder %s41_s13, %s41_s13 }
  0x2c   :  { %p420_p5 = scmp.ne.s32.totalorder %s41_s13, %s419_s21  ;;  %p425_p7 = scmp.lt.s32.totalorder %s419_s21, %s419_s21 }
  0x2e   :  { %p426_p8 = por %p425_p7, %p424_p6 }
  0x30   :  { %p427_p9 = pnand %p426_p8, %p420_p5 }
  0x32   :  { %430 = shalt.err (!%p427_p9)
}
  0x33   :  { %46 = dma.hbm_to_vmem [thread:$0]  %s546_s2, 2048, %s41_s13, [#allocation6], %s460_s22, %s460_s22, %s461_s23  }
  0x34   :  { %453 = dma.done.wait [#allocation3], 128  }
  0x35   :  { %454 = vsyncadd [#allocation3], 4294967168 }
  0x36   :  { %455 = dma.done.wait [#allocation6], 2560  }
  0x37   :  { %456 = vsyncadd [#allocation6], 4294964736  ;;  %v466_v0 = vmov 0   ;;  %v334_v1 = vld [vmem:[#allocation5 + $0x4] ss:$8 sps:$4 sm:$0xff]   ;;  %v340_v8 = vld [vmem:[#allocation2] sm:$0xff]  }
  0x38   :  { %124 = vmatprep.mubr.bf16.mxu0 %v466_v0  ;;  %268 = vmatprep.mubr.bf16.mxu1 %v466_v0  ;;  %v336_v2 = vld [vmem:[#allocation5] ss:$8 sps:$4 sm:$0xff]   ;;  %v337_v3 = vld [vmem:[#allocation5 + $0x14] ss:$8 sps:$4 sm:$0xff]   ;;  %v339_v4 = vld [vmem:[#allocation5 + $0x10] ss:$8 sps:$4 sm:$0xff]  }
  0x39   :  { %92 = vmatprep.subr.bf16.mxu0 %v334_v1  ;;  %v341_v5 = vld [vmem:[#allocation7 + $0x4] ss:$8 sps:$4 sm:$0xff]   ;;  %v343_v6 = vld [vmem:[#allocation7] ss:$8 sps:$4 sm:$0xff]   ;;  %v344_v7 = vld [vmem:[#allocation7 + $0x14] ss:$8 sps:$4 sm:$0xff]  }
  0x3a   :  { %93 = vmatpush1.bf16.msra.mxu0 %v336_v2  ;;  %236 = vmatprep.subr.bf16.mxu1 %v341_v5  ;;  %vm88_vm0 = vcmask 261120   ;;  %v346_v9 = vld [vmem:[#allocation7 + $0x10] ss:$8 sps:$4 sm:$0xff]   ;;  %v347_v10 = vld [vmem:[#allocation7 + $0x24] ss:$8 sps:$4 sm:$0xff]   ;;  %s467_s2 = smov [#allocation8]  }
  0x3b   :  { %94 = vmatprep.subr.bf16.mxu0 %v337_v3  ;;  %237 = vmatpush1.bf16.msra.mxu1 %v343_v6  ;;  %v349_v11 = vld [vmem:[#allocation7 + $0x20] ss:$8 sps:$4 sm:$0xff]   ;;  %v350_v12 = vld [vmem:[#allocation7 + $0x34] ss:$8 sps:$4 sm:$0xff]   ;;  %v352_v13 = vld [vmem:[#allocation7 + $0x30] ss:$8 sps:$4 sm:$0xff]  }
  0x3c   :  { %238 = vmatprep.subr.bf16.mxu1 %v344_v7  ;;  %v353_v14 = vld [vmem:[#allocation7 + $0x44] ss:$8 sps:$4 sm:$0xff]   ;;  %v355_v15 = vld [vmem:[#allocation7 + $0x40] ss:$8 sps:$4 sm:$0xff]   ;;  %v356_v16 = vld [vmem:[#allocation7 + $0x54] ss:$8 sps:$4 sm:$0xff]  }
  0x3d   :  { %v358_v17 = vld [vmem:[#allocation7 + $0x50] ss:$8 sps:$4 sm:$0xff]   ;;  %v359_v18 = vld [vmem:[#allocation7 + $0x64] ss:$8 sps:$4 sm:$0xff]   ;;  %v361_v19 = vld [vmem:[#allocation7 + $0x60] ss:$8 sps:$4 sm:$0xff]  }
  0x3e   :  { %95 = vmatpush1.bf16.msra.mxu0 %v339_v4  ;;  %v362_v20 = vld [vmem:[#allocation7 + $0x74] ss:$8 sps:$4 sm:$0xff]   ;;  %v364_v21 = vld [vmem:[#allocation7 + $0x70] ss:$8 sps:$4 sm:$0xff]   ;;  %s288_s22 = sshll.u32 %s467_s2, 4  ;;  %s289_s22 = int_to_ptr.vmem [resolvable:$true] %s288_s22 }
  0x3f   :  { %239 = vmatpush1.bf16.msra.mxu1 %v346_v9  ;;  %s431_s23 = scalar_lea.vmem %s289_s22, 512  ;;  %p436_p11 = scmp.lt.s32.totalorder %s289_s22, %s289_s22 }
  0x40   :  { %240 = vmatprep.subr.bf16.mxu1 %v347_v10  ;;  %p432_p10 = scmp.ne.s32.totalorder %s289_s22, %s431_s23  ;;  %p437_p12 = scmp.lt.s32.totalorder %s431_s23, %s431_s23 }
  0x41   :  { %306 = vmatmul.mubr.msk.bf16.vlgmr.msra.gmra.mrb[0].mxu0 %vm88_vm0, %v340_v8 }
  0x42   :  { %p438_p13 = por %p437_p12, %p436_p11 }
  0x43   :  { %241 = vmatpush1.bf16.msra.mxu1 %v349_v11 }
  0x44   :  { %242 = vmatprep.subr.bf16.mxu1 %v350_v12  ;;  %p439_p0 = pnand %p438_p13, %p432_p10 }
  0x47   :  { %243 = vmatpush1.bf16.msra.mxu1 %v352_v13 }
  0x48   :  { %244 = vmatprep.subr.bf16.mxu1 %v353_v14 }
  0x4b   :  { %245 = vmatpush1.bf16.msra.mxu1 %v355_v15 }
  0x4c   :  { %246 = vmatprep.subr.bf16.mxu1 %v356_v16 }
  0x4f   :  { %247 = vmatpush1.bf16.msra.mxu1 %v358_v17 }
  0x50   :  { %248 = vmatprep.subr.bf16.mxu1 %v359_v18 }
  0x53   :  { %249 = vmatpush1.bf16.msra.mxu1 %v361_v19 }
  0x54   :  { %250 = vmatprep.subr.bf16.mxu1 %v362_v20 }
  0x57   :  { %251 = vmatpush1.bf16.msra.mxu1 %v364_v21 }
 0x114   :  { %v126_v22 = vpop.f32.mrb[0].mxu0 }
 0x115   :  { %v135_v23 = vmax.f32 %v126_v22, 0.0  ;;  %v128_v24 = vpop.f32.mrb[1].mxu0 }
 0x116   :  { %v130_v25 = vpop.f32.mrb[2].mxu0 }
 0x117   :  { %v137_v26 = vadd.f32 %v135_v23, %v128_v24  ;;  %v136_v27 = vmax.f32 %v130_v25, 0.0  ;;  %v132_v28 = vpop.f32.mrb[3].mxu0 }
 0x119   :  { %v138_v29 = vadd.f32 %v136_v27, %v132_v28 }
 0x11b   :  { %v139_v30 = vpack.c.bf16 %v138_v29, %v137_v26 }
 0x11d   :  { %269 = vmatmul.mubr.bf16.vlgmr.msra.gmra.mrb[0].mxu1 %v139_v30 }
 0x1f0   :  { %v270_v31 = vpop.f32.mrb[0].mxu1 }
 0x1f1   :  { %279 = vst [vmem:[#allocation8] sm:$0xff] %v270_v31  ;;  %v272_v32 = vpop.f32.mrb[1].mxu1 }
 0x1f2   :  { %280 = vst [vmem:[#allocation8 + $0x8] sm:$0xff] %v272_v32  ;;  %v274_v33 = vpop.f32.mrb[2].mxu1 }
 0x1f3   :  { %281 = vst [vmem:[#allocation8 + $0x10] sm:$0xff] %v274_v33  ;;  %v276_v34 = vpop.f32.mrb[3].mxu1 }
 0x1f4   :  { %282 = vst [vmem:[#allocation8 + $0x18] sm:$0xff] %v276_v34 }
 0x1f5   :  { %442 = shalt.err (!%p439_p0)
}
 0x1f6   :  { %s443_s27 = scalar_lea.hbm %s547_s3, 512 }
 0x1f7   :  { %p444_p1 = scmp.ne.s32.totalorder %s547_s3, %s443_s27  ;;  %p447_p2 = scmp.lt.u32.totalorder %s443_s27, %s547_s3 }
 0x1f9   :  { %p449_p3 = pnand %p447_p2, %p444_p1 }
 0x1fb   :  { %452 = shalt.err (!%p449_p3)
}
 0x1fc   :  { %s468_s5 = smov 256   ;;  %s469_s6 = smov 16  }
 0x1fd   :  { %294 = dma.vmem_to_hbm [thread:$0]  %s289_s22, 512, %s547_s3, [#allocation4], %s468_s5, %s468_s5, %s469_s6  }
 0x1fe   :  { %457 = dma.done.wait [#allocation4], 512  }
 0x1ff   :  { %458 = vsyncadd [#allocation4], 4294966784 }
 0x200   :  { %298 = vsyncpa [#allocation3], 1 }
 0x201   :  { %299 = vsyncpa [#allocation6], 1 }
 0x202   :  { %300 = vsyncpa [#allocation4], 1 }

</bundles_post_ra>
